<compile_context>
chip_gen: v7x
topology: tpu7x:2x2x1
jax: 0.10.0
libtpu: 0.0.40
codegen_flags: <defaults>
</compile_context>

<pallas_src>
import jax
import jax.numpy as jnp
from jax.experimental import pallas as pl
from jax.experimental.pallas import tpu as pltpu


def _linear_bias_kernel(x_ref, w_ref, b_ref, o_ref):
    """One (i, j) grid step: o = (x_tile @ w_tile + bias_tile)."""
    acc = jnp.dot(x_ref[...], w_ref[...], preferred_element_type=jnp.float32)
    o_ref[...] = (acc + b_ref[...].astype(jnp.float32)).astype(o_ref.dtype)


def _round_up(x, m):
    return ((x + m - 1) // m) * m


def _sublane_align(dtype):
    itemsize = jnp.dtype(dtype).itemsize
    return {4: 8, 2: 16, 1: 32}.get(itemsize, 8)


def vision_proj(image_encoders, weight_t, bias, *, tm=512, tn=512,
                operand_dtype=None, vmem_budget_bytes=24 * 1024 * 1024):
    """image_encoders: [B, S, Din]; weight_t: [Din, Dout] (= W.T); bias: [Dout].

    operand_dtype: optionally cast x / W to a narrower dtype (e.g. bf16) for
    the MXU; accumulation stays f32.  Default None keeps the input dtype.
    """
    B, S, Din = image_encoders.shape
    Dout = weight_t.shape[1]
    M = B * S

    x2d = image_encoders.reshape(M, Din)
    out_dtype = image_encoders.dtype

    if operand_dtype is not None:
        # Ideally the weight is stored in this dtype at init time; casting here
        # still halves the per-call HBM read of the dominant operand.
        x2d = x2d.astype(operand_dtype)
        weight_t = weight_t.astype(operand_dtype)

    x_dt = x2d.dtype
    w_dt = weight_t.dtype

    # ---- Tile selection -----------------------------------------------------
    # Full K per tile (Din is small: 768 / 1152 both fit easily in VMEM).
    K_pad = _round_up(Din, 128)

    m_align = _sublane_align(x_dt)
    tm_ = min(tm, _round_up(M, m_align))
    tn_ = min(tn, _round_up(Dout, 128))

    # v7x megacore: if M has only one tile, make sure N has >=2 "parallel"
    # blocks so both TensorCores get work (neutral on v5e/v6e).
    if _round_up(M, tm_) // tm_ == 1 and _round_up(Dout, tn_) // tn_ == 1 and tn_ >= 256:
        tn_ = _round_up(tn_ // 2, 128)

    # Keep the double-buffered per-step footprint under the scoped VMEM budget
    # (x tile + w tile + bias tile + out tile, x2 for double buffering).
    def footprint(tm_v, tn_v):
        return 2 * (
            tm_v * K_pad * x_dt.itemsize
            + K_pad * tn_v * w_dt.itemsize
            + tn_v * jnp.dtype(jnp.float32).itemsize
            + tm_v * tn_v * jnp.dtype(out_dtype).itemsize
        )

    while footprint(tm_, tn_) > vmem_budget_bytes and tn_ > 128:
        tn_ = _round_up(tn_ // 2, 128)
    while footprint(tm_, tn_) > vmem_budget_bytes and tm_ > m_align:
        tm_ = max(m_align, _round_up(tm_ // 2, m_align))

    M_pad = _round_up(M, tm_)
    N_pad = _round_up(Dout, tn_)

    # ---- Padding (only fires for non-aligned shapes; 768/1152 and 512 are
    # 128-multiples so K/N padding is normally a no-op; M padding is tiny). ---
    if (M_pad, K_pad) != (M, Din):
        x2d = jnp.pad(x2d, ((0, M_pad - M), (0, K_pad - Din)))
    w_p = weight_t
    if (K_pad, N_pad) != (Din, Dout):
        # NOTE: for production, pad/pack the weight once at init, not per call.
        w_p = jnp.pad(w_p, ((0, K_pad - Din), (0, N_pad - Dout)))
    b_p = bias
    if N_pad != Dout:
        b_p = jnp.pad(b_p, ((0, N_pad - Dout),))
    b2d = b_p.reshape(1, N_pad).astype(jnp.float32)

    grid = (M_pad // tm_, N_pad // tn_)

    cost = pl.CostEstimate(
        flops=2 * M * Din * Dout,
        transcendentals=0,
        bytes_accessed=(
            M * Din * x_dt.itemsize
            + Din * Dout * w_dt.itemsize
            + Dout * jnp.dtype(jnp.float32).itemsize
            + M * Dout * jnp.dtype(out_dtype).itemsize
        ),
    )

    out2d = pl.pallas_call(
        _linear_bias_kernel,
        out_shape=jax.ShapeDtypeStruct((M_pad, N_pad), out_dtype),
        grid_spec=pltpu.PrefetchScalarGridSpec(
            num_scalar_prefetch=0,
            grid=grid,
            in_specs=[
                pl.BlockSpec((tm_, K_pad), lambda i, j: (i, 0)),   # x row-panel
                pl.BlockSpec((K_pad, tn_), lambda i, j: (0, j)),   # W^T col-panel
                pl.BlockSpec((1, tn_), lambda i, j: (0, j)),       # bias tile
            ],
            out_specs=pl.BlockSpec((tm_, tn_), lambda i, j: (i, j)),
        ),
        compiler_params=pltpu.CompilerParams(
            # Both axes independent: shards across the 2 TCs on v7x,
            # neutral on single-TC v5e/v6e.
            dimension_semantics=("parallel", "parallel"),
        ),
        cost_estimate=cost,
    )(x2d, w_p, b2d)

    return out2d[:M, :Dout].reshape(B, S, Dout)


if __name__ == "__main__":
    # Small shapes consistent with the module defaults:
    # [batch, seq, ve_hidden=768] -> [batch, seq, hidden=512]
    B, S = 2, 8
    VE_HIDDEN, HIDDEN = 768, 512

    key = jax.random.PRNGKey(0)
    kx, kw, kb = jax.random.split(key, 3)

    # PyTorch Linear weight is [out, in]; store its transpose [in, out].
    weight_t = (jax.random.normal(kw, (VE_HIDDEN, HIDDEN), dtype=jnp.float32)
                * (1.0 / VE_HIDDEN ** 0.5))
    bias = jax.random.normal(kb, (HIDDEN,), dtype=jnp.float32) * 0.01

    image_encoders = jax.random.normal(kx, (B, S, VE_HIDDEN), dtype=jnp.float32)

    out = vision_proj(image_encoders, weight_t, bias)
    out = jax.block_until_ready(out)

    # Reference check (same semantics as nn.Linear applied on the last dim).
    ref = image_encoders @ weight_t + bias
    assert out.shape == (B, S, HIDDEN)
    assert jnp.allclose(out, ref, atol=1e-4, rtol=1e-4)

    # Optional bf16-operand fast path (bandwidth-bound regime): looser check.
    out_bf16 = jax.block_until_ready(
        vision_proj(image_encoders, weight_t, bias, operand_dtype=jnp.bfloat16))
    assert jnp.allclose(out_bf16, ref, atol=3e-2, rtol=3e-2)

    print("KERNEL_OK")
</pallas_src>

<mosaic_0001>
module attributes {stable_mosaic.version = 11 : i64} {
  func.func @_linear_bias_kernel(%arg0: i32, %arg1: i32, %arg2: memref<16x768xf32, #tpu.memory_space<vmem>>, %arg3: memref<768x256xf32, #tpu.memory_space<vmem>>, %arg4: memref<1x256xf32, #tpu.memory_space<vmem>>, %arg5: memref<16x256xf32, #tpu.memory_space<vmem>>) attributes {dimension_semantics = [#tpu.dimension_semantics<parallel>, #tpu.dimension_semantics<parallel>], iteration_bounds = array<i64: 1, 2>, scalar_prefetch = 0 : i64, scratch_operands = 0 : i64, tpu.core_type = #tpu.core_type<tc>, window_params = [{transform_indices = @transform_0, window_bounds = array<i64: 16, 768>}, {transform_indices = @transform_1, window_bounds = array<i64: 768, 256>}, {transform_indices = @transform_2, window_bounds = array<i64: 1, 256>}, {transform_indices = @transform_3, window_bounds = array<i64: 16, 256>}]} {
    %c0 = arith.constant 0 : index
    %c0_0 = arith.constant 0 : index
    %0 = vector.load %arg2[%c0, %c0_0] : memref<16x768xf32, #tpu.memory_space<vmem>>, vector<16x768xf32>
    %c0_1 = arith.constant 0 : index
    %c0_2 = arith.constant 0 : index
    %1 = vector.load %arg3[%c0_1, %c0_2] : memref<768x256xf32, #tpu.memory_space<vmem>>, vector<768x256xf32>
    %cst = arith.constant dense<0.000000e+00> : vector<16x256xf32>
    %2 = tpu.matmul %0, %1, %cst {dimension_numbers = #tpu.dot_dimension_numbers<[1], [0], [0], [1], [0, 0, 1, 1], [], []>} : vector<16x768xf32>, vector<768x256xf32>, vector<16x256xf32> -> vector<16x256xf32>
    %c0_3 = arith.constant 0 : index
    %c0_4 = arith.constant 0 : index
    %3 = vector.load %arg4[%c0_3, %c0_4] : memref<1x256xf32, #tpu.memory_space<vmem>>, vector<1x256xf32>
    %4 = vector.broadcast %3 : vector<1x256xf32> to vector<16x256xf32>
    %5 = arith.addf %2, %4 : vector<16x256xf32>
    %c0_5 = arith.constant 0 : index
    %c0_6 = arith.constant 0 : index
    %6 = vector.load %arg5[%c0_5, %c0_6] : memref<16x256xf32, #tpu.memory_space<vmem>>, vector<16x256xf32>
    tpu.vector_store %arg5[%c0_5, %c0_6], %5 {strides = array<i32>} : memref<16x256xf32, #tpu.memory_space<vmem>>, vector<16x256xf32>,
    return
  }
  func.func @transform_0(%arg0: i32, %arg1: i32) -> (i32, i32) {
    %c0_i32 = arith.constant 0 : i32
    %c0_i32_0 = arith.constant 0 : i32
    return %arg0, %c0_i32 : i32, i32
  }
  func.func @transform_1(%arg0: i32, %arg1: i32) -> (i32, i32) {
    %c0_i32 = arith.constant 0 : i32
    %c0_i32_0 = arith.constant 0 : i32
    return %c0_i32, %arg1 : i32, i32
  }
  func.func @transform_2(%arg0: i32, %arg1: i32) -> (i32, i32) {
    %c0_i32 = arith.constant 0 : i32
    %c0_i32_0 = arith.constant 0 : i32
    return %c0_i32, %arg1 : i32, i32
  }
  func.func @transform_3(%arg0: i32, %arg1: i32) -> (i32, i32) {
    %c0_i32 = arith.constant 0 : i32
    return %arg0, %arg1 : i32, i32
  }
}

</mosaic_0001>

<bundles_post_ra>
// kernel: tpu_custom_call.1
= control target key start
LH: loop header
LB: loop body
LE: loop exit
PB: predicated region body
PF: predicated region fallthrough
CT: control target
= control target key end

     0   :  { %s1860_s0 = inlined_call_operand.hbm [shape: f32[16,768], index: 0, kind: input, shape index: {}]   ;;  %s1861_s1 = inlined_call_operand.hbm [shape: f32[768,512], index: 1, kind: input, shape index: {}]   ;;  %s1862_s2 = inlined_call_operand.hbm [shape: f32[1,512], index: 2, kind: input, shape index: {}]   ;;  %s1863_s3 = inlined_call_operand.hbm [shape: f32[16,512], index: 3, kind: output, shape index: {}]  }
   0x1   :  { %1872 = sst [smem:[#allocation13_spill]] %s1861_s1 }
   0x2   :  { %8 = vsyncpa [#allocation3], 0 }
   0x3   :  { %9 = vsyncpa [#allocation6], 0 }
   0x4   :  { %11 = vsyncpa [#allocation6 + $0x1], 0 }
   0x5   :  { %12 = vsyncpa [#allocation4], 0 }
   0x6   :  { %14 = vsyncpa [#allocation4 + $0x1], 0  ;;  %s1407_s12 = smov 0   ;;  %s1409_s13 = smov 0  }
   0x7   :  { %s1411_s14 = smov 0   ;;  %s1413_s15 = smov 0  }
   0x8   :  { %s1415_s16 = smov 0   ;;  %s1417_s17 = smov 0  }
   0x9 LB: > { %s29_s18 = sadd.s32 1, %s1369_s16  ;;  %s65_s19 = sadd.s32 1, %s1361_s14  ;;  %s1373_s17 = sphi %s1417_s17, %s20_s17   ;;  %s1369_s16 = sphi %s1415_s16, %s1896_s16   ;;  %s1365_s15 = sphi %s1413_s15, %s1895_s15   ;;  %s1361_s14 = sphi %s1411_s14, %s1894_s14   ;;  %s1357_s13 = sphi %s1409_s13, %s1893_s13   ;;  %s1353_s12 = sphi %s1407_s12, %s1892_s12  }
   0xa   : > { %p30_p0 = scmp.ge.s32.totalorder %s29_s18, 2  ;;  %p72_p1 = scmp.ne.s32.totalorder %s1361_s14, %s1357_s13 }
   0xb   : > { %p73_p2 = scmp.eq.s32.totalorder %s1373_s17, 0  ;;  %p1139_p5 = scmp.lt.s32.totalorder %s1373_s17, 2 }
   0xc   : > { %s1898_s18 = smov (%p30_p0, %s29_s18), 0  ;;  %s173_s21 = sand.u32 1, %s1373_s17  }
   0xd   : > { %1873 = sst [smem:[#allocation12_spill]] %s1898_s18  ;;  %p74_p4 = por %p73_p2, %p72_p1 }
   0xe   : > { %s62_s20 = ssub.s32 %s1369_s16, %s1898_s18  ;;  %s175_s22 = sand.u32 1, %s1361_s14  }
   0xf   : > { %p63_p6 = scmp.eq.s32.totalorder %s62_s20, 0  ;;  %s872_s23 = sshll.u32 %s1369_s16, 8 }
  0x10   : > { %s1111_s25 = smul.u32 1536, %s175_s22  ;;  %s1874_s1 = sld [smem:[#allocation13_spill]] }
  0x11   : > { %s1455_s24 = scalar_select %p63_p6, %s1361_s14, %s65_s19  }
  0x12   : > { %p1464_p7 = pnand %p1139_p5, %p74_p4  ;;  %s177_s30 = scalar_lea.vmem [#allocation5], %s1111_s25 }
  0x13   : > { %s184_s4 = sshll.u32 %s177_s30, 4  ;;  %s1470_s5 = scalar_lea.sflag [#allocation6], %s173_s21  ;;  %s1468_s4 = int_to_ptr.vmem [resolvable:$true] %s184_s4 }
  0x14   : > { %s1875_s29 = scalar_select %p1464_p7, 1, 0 }
  0x15   : > { %p1866_p9 = pneg %p1464_p7 }
  0x16   : > { %s1462_s28 = scalar_lea.hbm %s1874_s1, %s872_s23  ;;  %s1204_s9 = scalar_lea.hbm %s1874_s1, 49152 }
  0x17   : > { %s1199_s6 = scalar_lea.hbm %s1462_s28, 24576  ;;  %p1205_p12 = scmp.lt.u32.totalorder %s1462_s28, %s1874_s1 }
  0x18   : > { %p1200_p8 = scmp.ne.s32.totalorder %s1462_s28, %s1199_s6  ;;  %p1206_p13 = scmp.lt.u32.totalorder %s1204_s9, %s1199_s6 }
  0x19   : > { %p1208_p2 = scmp.lt.u32.totalorder %s1199_s6, %s1462_s28 }
  0x1a   : > { %p1202_p10 = pnand %p1866_p9, %p1200_p8  ;;  %p1207_p0 = por %p1206_p13, %p1205_p12 }
  0x1c   : > { %p1203_p11 = pneg %p1202_p10  ;;  %p1209_p4 = por %p1208_p2, %p1207_p0 }
  0x1e   : > { %p1210_p5 = pnand %p1209_p4, %p1203_p11 }
  0x20   : > { %1213 = shalt.err (!%p1210_p5)
}
  0x21   : > { %s1214_s19 = scalar_lea.vmem %s1468_s4, 24576  ;;  %s1375_s20 = smov [#allocation5]  }
  0x22   : > { %p1215_p6 = scmp.ne.s32.totalorder %s1468_s4, %s1214_s19  ;;  %s1219_s21 = sshll.u32 %s1375_s20, 4  ;;  %s1220_s21 = int_to_ptr.vmem [resolvable:$false] %s1219_s21 }
  0x23   : > { %s1221_s23 = scalar_lea.vmem %s1220_s21, 49152  ;;  %p1222_p3 = scmp.lt.s32.totalorder %s1468_s4, %s1220_s21 }
  0x24   : > { %p1217_p8 = pnand %p1215_p6, %p1866_p9  ;;  %p1223_p12 = scmp.lt.s32.totalorder %s1221_s23, %s1214_s19 }
  0x26   : > { %p1218_p10 = pneg %p1217_p8  ;;  %p1224_p13 = por %p1223_p12, %p1222_p3 }
  0x28   : > { %p1225_p0 = pnand %p1224_p13, %p1218_p10 }
  0x2a   : > { %1228 = shalt.err (!%p1225_p0)
}
  0x2b   : > { %s1376_s25 = smov 512   ;;  %s1377_s26 = smov 256  }
  0x2c   : > { %s1378_s27 = smov 16   ;;  %s1499_s30 = sadd.s32 4294967295, %s1373_s17  }
  0x2d   : > { %1130 = dma.hbm_to_vmem [thread:$0]  (!%p1464_p7), %s1462_s28, 24576, %s1468_s4, %s1470_s5, %s1376_s25, %s1377_s26, %s1378_s27  }
  0x2e   : > { %s854_s6 = sadd.s32 4294967294, %s1373_s17   ;;  %p78_p3 = scmp.ne.s32.totalorder %s1357_s13, %s1353_s12 }
  0x2f   : > { %p1865_p11 = scmp.eq.s32.totalorder %s1499_s30, 0  ;;  %p130_p2 = scmp.eq.s32.totalorder %s1499_s30, 1 }
  0x30   : > { %p136_p4 = scmp.eq.s32.totalorder %s854_s6, 1  ;;  %p855_p6 = scmp.ge.s32.totalorder %s1373_s17, 1 }
  0x31   : > { %p1508_p5 = por %p1865_p11, %p78_p3  ;;  %p1516_p8 = por %p130_p2, %p72_p1 }
  0x32   : > { %p1520_p10 = por %p136_p4, %p78_p3  ;;  %p143_p12 = scmp.lt.s32.totalorder %s1373_s17, 3 }
  0x33   : > { %s1876_s7 = scalar_select %p1508_p5, 1, 0 }
  0x34   : > { %s1877_s28 = scalar_select %p1516_p8, 1, 0 }
  0x35   : > { %s1878_s4 = scalar_select %p1520_p10, 1, 0 }
  0x36   : > { %p1525_p13 = pnand %p855_p6, %p143_p12  ;;  %s1379_s9 = smov [#allocation2]  }
  0x37   : > { %s159_s10 = sshll.u32 %s1379_s9, 4  ;;  %s860_s11 = sshll.u32 %s175_s22, 1  ;;  %s1529_s10 = int_to_ptr.vmem [resolvable:$true] %s159_s10 }
  0x38   : > { %s1879_s8 = scalar_select %p1525_p13, 1, 0 }
  0x39   : > { %p1123_p0 = pneg %p1525_p13  ;;  %s873_s19 = sshll.u32 %s1369_s16, 5 }
  0x3a   : > { %s1545_s25 = scalar_lea.hbm %s1862_s2, %s873_s19  ;;  %s198_s26 = scalar_lea.vmem [#allocation7], %s860_s11 }
  0x3b   : > { %p1538_p1 = pnand %p1123_p0, %p1865_p11  ;;  %s206_s27 = sshll.u32 %s198_s26, 4  ;;  %s1547_s27 = int_to_ptr.vmem [resolvable:$true] %s206_s27 }
  0x3c   : > { %s1229_s22 = scalar_lea.hbm %s1860_s0, 1536 }
  0x3d   : > { %p1230_p3 = scmp.ne.s32.totalorder %s1860_s0, %s1229_s22  ;;  %p1231_p2 = pneg %p1538_p1 }
  0x3e   : > { %p1236_p12 = scmp.lt.u32.totalorder %s1229_s22, %s1860_s0 }
  0x3f   : > { %p1232_p4 = pnand %p1231_p2, %p1230_p3 }
  0x41   : > { %p1233_p6 = pneg %p1232_p4 }
  0x43   : > { %p1238_p0 = pnand %p1236_p12, %p1233_p6 }
  0x45   : > { %1241 = shalt.err (!%p1238_p0)
}
  0x46   : > { %s1242_s11 = scalar_lea.vmem %s1529_s10, 1536  ;;  %p1250_p8 = scmp.lt.s32.totalorder %s1529_s10, %s1529_s10 }
  0x47   : > { %p1243_p11 = scmp.ne.s32.totalorder %s1529_s10, %s1242_s11  ;;  %p1251_p5 = scmp.lt.s32.totalorder %s1242_s11, %s1242_s11 }
  0x49   : > { %p1245_p9 = pnand %p1243_p11, %p1231_p2  ;;  %p1252_p13 = por %p1251_p5, %p1250_p8 }
  0x4b   : > { %p1246_p10 = pneg %p1245_p9 }
  0x4d   : > { %p1253_p7 = pnand %p1252_p13, %p1246_p10 }
  0x4f   : > { %1256 = shalt.err (!%p1253_p7)
}
  0x50   : > { %s1380_s1 = smov 768   ;;  %s1381_s18 = smov 48  }
  0x51   : > { %1126 = dma.hbm_to_vmem [thread:$0]  (!%p1538_p1), %s1860_s0, 1536, %s1529_s10, [#allocation3], %s1380_s1, %s1380_s1, %s1381_s18  }
  0x52   : > { %s1257_s6 = scalar_lea.hbm %s1545_s25, 32  ;;  %p1881_p11 = scmp.ne.s32.totalorder %s1875_s29, 0 }
  0x53   : > { %p1258_p9 = scmp.ne.s32.totalorder %s1545_s25, %s1257_s6  ;;  %s1262_s21 = scalar_lea.hbm %s1862_s2, 64 }
  0x54   : > { %p1882_p5 = pneg %p1881_p11  ;;  %p1263_p10 = scmp.lt.u32.totalorder %s1545_s25, %s1862_s2 }
  0x55   : > { %p1264_p13 = scmp.lt.u32.totalorder %s1262_s21, %s1257_s6  ;;  %p1266_p2 = scmp.lt.u32.totalorder %s1257_s6, %s1545_s25 }
  0x56   : > { %p1260_p8 = pnand %p1258_p9, %p1882_p5 }
  0x57   : > { %p1265_p3 = por %p1264_p13, %p1263_p10 }
  0x58   : > { %p1261_p7 = pneg %p1260_p8 }
  0x59   : > { %p1267_p4 = por %p1266_p2, %p1265_p3 }
  0x5b   : > { %p1268_p6 = pnand %p1267_p4, %p1261_p7 }
  0x5d   : > { %1271 = shalt.err (!%p1268_p6)
}
  0x5e   : > { %s1272_s10 = scalar_lea.vmem %s1547_s27, 32  ;;  %p1883_p12 = pmov %p1882_p5 }
  0x5f   : > { %p1273_p1 = scmp.ne.s32.totalorder %s1547_s27, %s1272_s10  ;;  %s1382_s20 = smov [#allocation7]  }
  0x60   : > { %s1277_s1 = sshll.u32 %s1382_s20, 4  ;;  %s1278_s1 = int_to_ptr.vmem [resolvable:$false] %s1277_s1 }
  0x61   : > { %p1275_p0 = pnand %p1273_p1, %p1883_p12  ;;  %s1279_s18 = scalar_lea.vmem %s1278_s1, 64 }
  0x62   : > { %p1280_p5 = scmp.lt.s32.totalorder %s1547_s27, %s1278_s1  ;;  %p1281_p8 = scmp.lt.s32.totalorder %s1279_s18, %s1272_s10 }
  0x63   : > { %p1276_p9 = pneg %p1275_p0 }
  0x64   : > { %p1282_p10 = por %p1281_p8, %p1280_p5 }
  0x66   : > { %p1283_p13 = pnand %p1282_p10, %p1276_p9 }
  0x68   : > { %1286 = shalt.err (!%p1283_p13)
}
  0x69   : > { %1133 = dma.hbm_to_vmem [thread:$0]  (!%p1881_p11), %s1545_s25, 32, %s1547_s27, %s1470_s5  }
  0x6a   : > { %p1884_p7 = scmp.ne.s32.totalorder %s1879_s8, 0 }
  0x6b   : > { %p1885_p3 = scmp.eq.s32.totalorder (!%p1884_p7), %s1499_s30, 0 }
  0x6c   : > { %215 = sbr.rel (%p1884_p7) target bundleno = 485 (0x1e5), region = 32 }
  0x73   : > { %1340 = dma.done.wait (%p1885_p3), [#allocation3], 1536   ;;  %p1886_p2 = pmov %p1885_p3 }
  0x74   : > { %s221_s19 = sand.u32 1, %s1499_s30   ;;  %s1602_s26 = sand.u32 1, %s1357_s13  }
  0x75   : > { %1342 = vsyncadd (%p1886_p2), [#allocation3], 4294965760  ;;  %s1112_s29 = smul.u32 1536, %s1602_s26  ;;  %s222_s6 = scalar_lea.sflag [#allocation6], %s221_s19 }
  0x76   : > { %p1887_p11 = scmp.ne.s32.totalorder %s1876_s7, 0 }
  0x77   : > { %s1605_s9 = scalar_lea.vmem [#allocation5], %s1112_s29 }
  0x78   : > { %1344 = dma.done.wait (%p1887_p11), %s222_s6, 24608  }
  0x79   : > { %1346 = vsyncadd (%p1887_p11), %s222_s6, 4294942688  ;;  %v280_v0 = vld [vmem:[%s1605_s9 + $0x8] sm:$0xff]  ;;  %v282_v1 = vld [vmem:[%s1605_s9 + $0x18] sm:$0xff]  ;;  %s865_s5 = sshll.u32 %s1602_s26, 1  ;;  %s866_s7 = sshll.u32 %s1602_s26, 5 }
  0x7a   : > { %v344_v2 = vld [vmem:[%s1605_s9 + $0x208] sm:$0xff]  ;;  %v875_v3 = vpack.c.bf16 %v282_v1, %v280_v0  ;;  %v346_v4 = vld [vmem:[%s1605_s9 + $0x218] sm:$0xff]  ;;  %v279_v5 = vld [vmem:[%s1605_s9] sm:$0xff]  ;;  %s234_s30 = scalar_lea.vmem [#allocation7], %s865_s5  ;;  %s261_s8 = scalar_lea.vmem [#allocation8], %s866_s7 }
  0x7b   : > { %v281_v6 = vld [vmem:[%s1605_s9 + $0x10] sm:$0xff]  ;;  %v939_v7 = vpack.c.bf16 %v346_v4, %v344_v2  ;;  %v343_v9 = vld [vmem:[%s1605_s9 + $0x200] sm:$0xff]  ;;  %v284_v11 = vld [vmem:[%s1605_s9 + $0x28] sm:$0xff]  ;;  %s735_s25 = sshll.u32 %s261_s8, 4  ;;  %s874_s27 = sshll.u32 %s1365_s15, 8  ;;  %s1806_s25 = int_to_ptr.vmem [resolvable:$true] %s735_s25 }
  0x7c   : > { %v877_v8 = vpack.c.bf16 %v281_v6, %v279_v5  ;;  %v345_v10 = vld [vmem:[%s1605_s9 + $0x210] sm:$0xff]  ;;  %876 = vmatprep.subr.bf16.mxu1 %v875_v3  ;;  %v286_v13 = vld [vmem:[%s1605_s9 + $0x38] sm:$0xff]  ;;  %v348_v14 = vld [vmem:[%s1605_s9 + $0x228] sm:$0xff]  ;;  %s1811_s15 = scalar_lea.hbm %s1863_s3, %s874_s27  ;;  %s719_s23 = scalar_lea.sflag [#allocation4], %s1602_s26 }
  0x7d   : > { %v941_v12 = vpack.c.bf16 %v345_v10, %v343_v9  ;;  %v350_v15 = vld [vmem:[%s1605_s9 + $0x238] sm:$0xff]  ;;  %940 = vmatprep.subr.bf16.mxu0 %v939_v7  ;;  %v879_v16 = vpack.c.bf16 %v286_v13, %v284_v11  ;;  %v283_v18 = vld [vmem:[%s1605_s9 + $0x20] sm:$0xff]  ;;  %v285_v19 = vld [vmem:[%s1605_s9 + $0x30] sm:$0xff]  ;;  %s1287_s11 = scalar_lea.vmem %s1806_s25, 512  ;;  %p1888_p6 = scmp.ne.s32.totalorder %s1877_s28, 0 }
  0x7e   : > { %878 = vmatpush1.bf16.msra.mxu1 %v877_v8  ;;  %v943_v17 = vpack.c.bf16 %v350_v15, %v348_v14  ;;  %v347_v20 = vld [vmem:[%s1605_s9 + $0x220] sm:$0xff]  ;;  %v881_v21 = vpack.c.bf16 %v285_v19, %v283_v18  ;;  %v349_v22 = vld [vmem:[%s1605_s9 + $0x230] sm:$0xff]  ;;  %v288_v23 = vld [vmem:[%s1605_s9 + $0x48] sm:$0xff]  ;;  %p1288_p4 = scmp.ne.s32.totalorder %s1806_s25, %s1287_s11  ;;  %s1383_s10 = smov [#allocation8]  }
  0x7f   : > { %942 = vmatpush1.bf16.msra.mxu0 %v941_v12  ;;  %v290_v24 = vld [vmem:[%s1605_s9 + $0x58] sm:$0xff]  ;;  %880 = vmatprep.subr.bf16.mxu1 %v879_v16  ;;  %v945_v25 = vpack.c.bf16 %v349_v22, %v347_v20  ;;  %v352_v27 = vld [vmem:[%s1605_s9 + $0x248] sm:$0xff]  ;;  %v287_v29 = vld [vmem:[%s1605_s9 + $0x40] sm:$0xff]  ;;  %s1291_s20 = sshll.u32 %s1383_s10, 4  ;;  %s1292_s20 = int_to_ptr.vmem [resolvable:$false] %s1291_s20 }
  0x80   : > { %944 = vmatprep.subr.bf16.mxu0 %v943_v17  ;;  %v883_v26 = vpack.c.bf16 %v290_v24, %v288_v23  ;;  %v354_v28 = vld [vmem:[%s1605_s9 + $0x258] sm:$0xff]  ;;  %v289_v31 = vld [vmem:[%s1605_s9 + $0x50] sm:$0xff]  ;;  %v351_v32 = vld [vmem:[%s1605_s9 + $0x240] sm:$0xff]  ;;  %p1289_p1 = pnand %p1288_p4, %p1888_p6  ;;  %s1293_s1 = scalar_lea.vmem %s1292_s20, 1024 }
  0x81   : > { %v947_v30 = vpack.c.bf16 %v354_v28, %v352_v27  ;;  %v353_v33 = vld [vmem:[%s1605_s9 + $0x250] sm:$0xff]  ;;  %v885_v34 = vpack.c.bf16 %v289_v31, %v287_v29  ;;  %v292_v35 = vld [vmem:[%s1605_s9 + $0x68] sm:$0xff]  ;;  %v294_v36 = vld [vmem:[%s1605_s9 + $0x78] sm:$0xff]  ;;  %p1294_p0 = scmp.lt.s32.totalorder %s1806_s25, %s1292_s20  ;;  %p1295_p9 = scmp.lt.s32.totalorder %s1293_s1, %s1287_s11 }
  0x82   : > { %882 = vmatpush1.bf16.msra.mxu1 %v881_v21  ;;  %v356_v37 = vld [vmem:[%s1605_s9 + $0x268] sm:$0xff]  ;;  %v949_v38 = vpack.c.bf16 %v353_v33, %v351_v32  ;;  %v887_v39 = vpack.c.bf16 %v294_v36, %v292_v35  ;;  %v358_v40 = vld [vmem:[%s1605_s9 + $0x278] sm:$0xff]  ;;  %v291_v41 = vld [vmem:[%s1605_s9 + $0x60] sm:$0xff]  ;;  %p1290_p12 = pneg %p1289_p1 }
  0x83   : > { %946 = vmatpush1.bf16.msra.mxu0 %v945_v25  ;;  %884 = vmatprep.subr.bf16.mxu1 %v883_v26  ;;  %v293_v42 = vld [vmem:[%s1605_s9 + $0x70] sm:$0xff]  ;;  %v951_v43 = vpack.c.bf16 %v358_v40, %v356_v37  ;;  %v355_v44 = vld [vmem:[%s1605_s9 + $0x260] sm:$0xff]  ;;  %v296_v46 = vld [vmem:[%s1605_s9 + $0x88] sm:$0xff]  ;;  %p1296_p5 = por %p1295_p9, %p1294_p0 }
  0x84   : > { %948 = vmatprep.subr.bf16.mxu0 %v947_v30  ;;  %v357_v45 = vld [vmem:[%s1605_s9 + $0x270] sm:$0xff]  ;;  %v298_v47 = vld [vmem:[%s1605_s9 + $0x98] sm:$0xff]  ;;  %v360_v48 = vld [vmem:[%s1605_s9 + $0x288] sm:$0xff]  ;;  %v889_v50 = vpack.c.bf16 %v293_v42, %v291_v41 }
  0x85   : > { %v362_v49 = vld [vmem:[%s1605_s9 + $0x298] sm:$0xff]  ;;  %v953_v51 = vpack.c.bf16 %v357_v45, %v355_v44  ;;  %v891_v52 = vpack.c.bf16 %v298_v47, %v296_v46  ;;  %v295_v53 = vld [vmem:[%s1605_s9 + $0x80] sm:$0xff]  ;;  %v297_v54 = vld [vmem:[%s1605_s9 + $0x90] sm:$0xff]  ;;  %p1297_p8 = pnand %p1296_p5, %p1290_p12 }
  0x86   : > { %886 = vmatpush1.bf16.msra.mxu1 %v885_v34  ;;  %v359_v55 = vld [vmem:[%s1605_s9 + $0x280] sm:$0xff]  ;;  %v955_v56 = vpack.c.bf16 %v362_v49, %v360_v48  ;;  %v361_v57 = vld [vmem:[%s1605_s9 + $0x290] sm:$0xff]  ;;  %v300_v58 = vld [vmem:[%s1605_s9 + $0xa8] sm:$0xff]  ;;  %v893_v62 = vpack.c.bf16 %v297_v54, %v295_v53 }
  0x87   : > { %950 = vmatpush1.bf16.msra.mxu0 %v949_v38  ;;  %888 = vmatprep.subr.bf16.mxu1 %v887_v39  ;;  %v302_v59 = vld [vmem:[%s1605_s9 + $0xb8] sm:$0xff]  ;;  %v364_v60 = vld [vmem:[%s1605_s9 + $0x2a8] sm:$0xff]  ;;  %v957_v63 = vpack.c.bf16 %v361_v57, %v359_v55  ;;  %v299_v1 = vld [vmem:[%s1605_s9 + $0xa0] sm:$0xff] }
  0x88   : > { %952 = vmatprep.subr.bf16.mxu0 %v951_v43  ;;  %v366_v61 = vld [vmem:[%s1605_s9 + $0x2b8] sm:$0xff]  ;;  %v895_v0 = vpack.c.bf16 %v302_v59, %v300_v58  ;;  %v301_v2 = vld [vmem:[%s1605_s9 + $0xb0] sm:$0xff]  ;;  %v363_v3 = vld [vmem:[%s1605_s9 + $0x2a0] sm:$0xff] }
  0x89   : > { %v959_v4 = vpack.c.bf16 %v366_v61, %v364_v60  ;;  %v365_v5 = vld [vmem:[%s1605_s9 + $0x2b0] sm:$0xff]  ;;  %v304_v6 = vld [vmem:[%s1605_s9 + $0xc8] sm:$0xff]  ;;  %v306_v7 = vld [vmem:[%s1605_s9 + $0xd8] sm:$0xff]  ;;  %v897_v10 = vpack.c.bf16 %v301_v2, %v299_v1 }
  0x8a   : > { %890 = vmatpush1.bf16.msra.mxu1 %v889_v50  ;;  %v368_v8 = vld [vmem:[%s1605_s9 + $0x2c8] sm:$0xff]  ;;  %v370_v9 = vld [vmem:[%s1605_s9 + $0x2d8] sm:$0xff]  ;;  %v961_v11 = vpack.c.bf16 %v365_v5, %v363_v3  ;;  %v899_v12 = vpack.c.bf16 %v306_v7, %v304_v6  ;;  %v303_v13 = vld [vmem:[%s1605_s9 + $0xc0] sm:$0xff] }
  0x8b   : > { %954 = vmatpush1.bf16.msra.mxu0 %v953_v51  ;;  %892 = vmatprep.subr.bf16.mxu1 %v891_v52  ;;  %v305_v14 = vld [vmem:[%s1605_s9 + $0xd0] sm:$0xff]  ;;  %v367_v15 = vld [vmem:[%s1605_s9 + $0x2c0] sm:$0xff]  ;;  %v963_v16 = vpack.c.bf16 %v370_v9, %v368_v8  ;;  %v308_v18 = vld [vmem:[%s1605_s9 + $0xe8] sm:$0xff] }
  0x8c   : > { %956 = vmatprep.subr.bf16.mxu0 %v955_v56  ;;  %v369_v17 = vld [vmem:[%s1605_s9 + $0x2d0] sm:$0xff]  ;;  %v310_v19 = vld [vmem:[%s1605_s9 + $0xf8] sm:$0xff]  ;;  %v372_v20 = vld [vmem:[%s1605_s9 + $0x2e8] sm:$0xff]  ;;  %v901_v22 = vpack.c.bf16 %v305_v14, %v303_v13 }
  0x8d   : > { %v374_v21 = vld [vmem:[%s1605_s9 + $0x2f8] sm:$0xff]  ;;  %v965_v23 = vpack.c.bf16 %v369_v17, %v367_v15  ;;  %v903_v24 = vpack.c.bf16 %v310_v19, %v308_v18  ;;  %v307_v25 = vld [vmem:[%s1605_s9 + $0xe0] sm:$0xff]  ;;  %v309_v26 = vld [vmem:[%s1605_s9 + $0xf0] sm:$0xff] }
  0x8e   : > { %894 = vmatpush1.bf16.msra.mxu1 %v893_v62  ;;  %v371_v27 = vld [vmem:[%s1605_s9 + $0x2e0] sm:$0xff]  ;;  %v967_v28 = vpack.c.bf16 %v374_v21, %v372_v20  ;;  %v373_v29 = vld [vmem:[%s1605_s9 + $0x2f0] sm:$0xff]  ;;  %v312_v30 = vld [vmem:[%s1605_s9 + $0x108] sm:$0xff]  ;;  %v905_v34 = vpack.c.bf16 %v309_v26, %v307_v25 }
  0x8f   : > { %958 = vmatpush1.bf16.msra.mxu0 %v957_v63  ;;  %896 = vmatprep.subr.bf16.mxu1 %v895_v0  ;;  %v314_v31 = vld [vmem:[%s1605_s9 + $0x118] sm:$0xff]  ;;  %v376_v32 = vld [vmem:[%s1605_s9 + $0x308] sm:$0xff]  ;;  %v969_v35 = vpack.c.bf16 %v373_v29, %v371_v27  ;;  %v311_v37 = vld [vmem:[%s1605_s9 + $0x100] sm:$0xff] }
  0x90   : > { %960 = vmatprep.subr.bf16.mxu0 %v959_v4  ;;  %v378_v33 = vld [vmem:[%s1605_s9 + $0x318] sm:$0xff]  ;;  %v907_v36 = vpack.c.bf16 %v314_v31, %v312_v30  ;;  %v313_v38 = vld [vmem:[%s1605_s9 + $0x110] sm:$0xff]  ;;  %v375_v39 = vld [vmem:[%s1605_s9 + $0x300] sm:$0xff] }
  0x91   : > { %v971_v40 = vpack.c.bf16 %v378_v33, %v376_v32  ;;  %v377_v41 = vld [vmem:[%s1605_s9 + $0x310] sm:$0xff]  ;;  %v316_v42 = vld [vmem:[%s1605_s9 + $0x128] sm:$0xff]  ;;  %v318_v43 = vld [vmem:[%s1605_s9 + $0x138] sm:$0xff]  ;;  %v909_v46 = vpack.c.bf16 %v313_v38, %v311_v37 }
  0x92   : > { %898 = vmatpush1.bf16.msra.mxu1 %v897_v10  ;;  %v380_v44 = vld [vmem:[%s1605_s9 + $0x328] sm:$0xff]  ;;  %v382_v45 = vld [vmem:[%s1605_s9 + $0x338] sm:$0xff]  ;;  %v973_v47 = vpack.c.bf16 %v377_v41, %v375_v39  ;;  %v911_v48 = vpack.c.bf16 %v318_v43, %v316_v42  ;;  %v315_v49 = vld [vmem:[%s1605_s9 + $0x120] sm:$0xff] }
  0x93   : > { %962 = vmatpush1.bf16.msra.mxu0 %v961_v11  ;;  %900 = vmatprep.subr.bf16.mxu1 %v899_v12  ;;  %v317_v50 = vld [vmem:[%s1605_s9 + $0x130] sm:$0xff]  ;;  %v379_v51 = vld [vmem:[%s1605_s9 + $0x320] sm:$0xff]  ;;  %v975_v52 = vpack.c.bf16 %v382_v45, %v380_v44  ;;  %v320_v54 = vld [vmem:[%s1605_s9 + $0x148] sm:$0xff] }
  0x94   : > { %964 = vmatprep.subr.bf16.mxu0 %v963_v16  ;;  %v381_v53 = vld [vmem:[%s1605_s9 + $0x330] sm:$0xff]  ;;  %v322_v55 = vld [vmem:[%s1605_s9 + $0x158] sm:$0xff]  ;;  %v384_v56 = vld [vmem:[%s1605_s9 + $0x348] sm:$0xff]  ;;  %v913_v58 = vpack.c.bf16 %v317_v50, %v315_v49 }
  0x95   : > { %v386_v57 = vld [vmem:[%s1605_s9 + $0x358] sm:$0xff]  ;;  %v977_v59 = vpack.c.bf16 %v381_v53, %v379_v51  ;;  %v915_v60 = vpack.c.bf16 %v322_v55, %v320_v54  ;;  %v319_v61 = vld [vmem:[%s1605_s9 + $0x140] sm:$0xff]  ;;  %v321_v62 = vld [vmem:[%s1605_s9 + $0x150] sm:$0xff] }
  0x96   : > { %902 = vmatpush1.bf16.msra.mxu1 %v901_v22  ;;  %v383_v63 = vld [vmem:[%s1605_s9 + $0x340] sm:$0xff]  ;;  %v979_v0 = vpack.c.bf16 %v386_v57, %v384_v56  ;;  %v385_v1 = vld [vmem:[%s1605_s9 + $0x350] sm:$0xff]  ;;  %v324_v2 = vld [vmem:[%s1605_s9 + $0x168] sm:$0xff]  ;;  %v917_v6 = vpack.c.bf16 %v321_v62, %v319_v61 }
  0x97   : > { %966 = vmatpush1.bf16.msra.mxu0 %v965_v23  ;;  %904 = vmatprep.subr.bf16.mxu1 %v903_v24  ;;  %v326_v3 = vld [vmem:[%s1605_s9 + $0x178] sm:$0xff]  ;;  %v388_v4 = vld [vmem:[%s1605_s9 + $0x368] sm:$0xff]  ;;  %v323_v7 = vld [vmem:[%s1605_s9 + $0x160] sm:$0xff]  ;;  %v981_v8 = vpack.c.bf16 %v385_v1, %v383_v63 }
  0x98   : > { %968 = vmatprep.subr.bf16.mxu0 %v967_v28  ;;  %v390_v5 = vld [vmem:[%s1605_s9 + $0x378] sm:$0xff]  ;;  %v919_v9 = vpack.c.bf16 %v326_v3, %v324_v2  ;;  %v325_v10 = vld [vmem:[%s1605_s9 + $0x170] sm:$0xff]  ;;  %v387_v11 = vld [vmem:[%s1605_s9 + $0x360] sm:$0xff] }
  0x99   : > { %v389_v12 = vld [vmem:[%s1605_s9 + $0x370] sm:$0xff]  ;;  %v983_v13 = vpack.c.bf16 %v390_v5, %v388_v4  ;;  %v328_v14 = vld [vmem:[%s1605_s9 + $0x188] sm:$0xff]  ;;  %v330_v15 = vld [vmem:[%s1605_s9 + $0x198] sm:$0xff]  ;;  %v921_v20 = vpack.c.bf16 %v325_v10, %v323_v7 }
  0x9a   : > { %906 = vmatpush1.bf16.msra.mxu1 %v905_v34  ;;  %v268_v16 = vld [vmem:[#allocation2 + $0x8] sm:$0xff]  ;;  %v394_v18 = vld [vmem:[%s1605_s9 + $0x398] sm:$0xff]  ;;  %v985_v21 = vpack.c.bf16 %v389_v12, %v387_v11  ;;  %v923_v22 = vpack.c.bf16 %v330_v15, %v328_v14  ;;  %v327_v23 = vld [vmem:[%s1605_s9 + $0x180] sm:$0xff] }
  0x9b   : > { %970 = vmatpush1.bf16.msra.mxu0 %v969_v35  ;;  %908 = vmatprep.subr.bf16.mxu1 %v907_v36  ;;  %v392_v17 = vld [vmem:[%s1605_s9 + $0x388] sm:$0xff]  ;;  %v270_v19 = vld [vmem:[#allocation2 + $0x18] sm:$0xff]  ;;  %v329_v24 = vld [vmem:[%s1605_s9 + $0x190] sm:$0xff] }
  0x9c   : > { %972 = vmatprep.subr.bf16.mxu0 %v971_v40  ;;  %547 = vmatprep.mubr.f32.mxu1 %v268_v16  ;;  %v391_v25 = vld [vmem:[%s1605_s9 + $0x380] sm:$0xff]  ;;  %v987_v26 = vpack.c.bf16 %v394_v18, %v392_v17  ;;  %v393_v27 = vld [vmem:[%s1605_s9 + $0x390] sm:$0xff]  ;;  %v332_v28 = vld [vmem:[%s1605_s9 + $0x1a8] sm:$0xff]  ;;  %v925_v32 = vpack.c.bf16 %v329_v24, %v327_v23 }
  0x9d   : > { %624 = vmatprep.mubr.f32.mxu0 %v270_v19  ;;  %v334_v29 = vld [vmem:[%s1605_s9 + $0x1b8] sm:$0xff]  ;;  %v396_v30 = vld [vmem:[%s1605_s9 + $0x3a8] sm:$0xff]  ;;  %v989_v33 = vpack.c.bf16 %v393_v27, %v391_v25  ;;  %v331_v35 = vld [vmem:[%s1605_s9 + $0x1a0] sm:$0xff] }
  0x9e   : > { %910 = vmatpush1.bf16.msra.mxu1 %v909_v46  ;;  %v398_v31 = vld [vmem:[%s1605_s9 + $0x3b8] sm:$0xff]  ;;  %v927_v34 = vpack.c.bf16 %v334_v29, %v332_v28  ;;  %v333_v36 = vld [vmem:[%s1605_s9 + $0x1b0] sm:$0xff]  ;;  %v395_v37 = vld [vmem:[%s1605_s9 + $0x3a0] sm:$0xff] }
  0x9f   : > { %974 = vmatpush1.bf16.msra.mxu0 %v973_v47  ;;  %912 = vmatprep.subr.bf16.mxu1 %v911_v48  ;;  %v991_v38 = vpack.c.bf16 %v398_v31, %v396_v30  ;;  %v397_v39 = vld [vmem:[%s1605_s9 + $0x3b0] sm:$0xff]  ;;  %v336_v40 = vld [vmem:[%s1605_s9 + $0x1c8] sm:$0xff]  ;;  %v338_v41 = vld [vmem:[%s1605_s9 + $0x1d8] sm:$0xff]  ;;  %v929_v44 = vpack.c.bf16 %v333_v36, %v331_v35 }
  0xa0   : > { %976 = vmatprep.subr.bf16.mxu0 %v975_v52  ;;  %v400_v42 = vld [vmem:[%s1605_s9 + $0x3c8] sm:$0xff]  ;;  %v402_v43 = vld [vmem:[%s1605_s9 + $0x3d8] sm:$0xff]  ;;  %v993_v45 = vpack.c.bf16 %v397_v39, %v395_v37  ;;  %v931_v46 = vpack.c.bf16 %v338_v41, %v336_v40  ;;  %v335_v47 = vld [vmem:[%s1605_s9 + $0x1c0] sm:$0xff] }
  0xa1   : > { %v337_v48 = vld [vmem:[%s1605_s9 + $0x1d0] sm:$0xff]  ;;  %v399_v49 = vld [vmem:[%s1605_s9 + $0x3c0] sm:$0xff]  ;;  %v995_v50 = vpack.c.bf16 %v402_v43, %v400_v42  ;;  %v340_v52 = vld [vmem:[%s1605_s9 + $0x1e8] sm:$0xff] }
  0xa2   : > { %914 = vmatpush1.bf16.msra.mxu1 %v913_v58  ;;  %v401_v51 = vld [vmem:[%s1605_s9 + $0x3d0] sm:$0xff]  ;;  %v342_v53 = vld [vmem:[%s1605_s9 + $0x1f8] sm:$0xff]  ;;  %v404_v54 = vld [vmem:[%s1605_s9 + $0x3e8] sm:$0xff]  ;;  %v933_v56 = vpack.c.bf16 %v337_v48, %v335_v47 }
  0xa3   : > { %978 = vmatpush1.bf16.msra.mxu0 %v977_v59  ;;  %916 = vmatprep.subr.bf16.mxu1 %v915_v60  ;;  %v406_v55 = vld [vmem:[%s1605_s9 + $0x3f8] sm:$0xff]  ;;  %v997_v57 = vpack.c.bf16 %v401_v51, %v399_v49  ;;  %v935_v58 = vpack.c.bf16 %v342_v53, %v340_v52  ;;  %v339_v59 = vld [vmem:[%s1605_s9 + $0x1e0] sm:$0xff]  ;;  %v341_v60 = vld [vmem:[%s1605_s9 + $0x1f0] sm:$0xff] }
  0xa4   : > { %980 = vmatprep.subr.bf16.mxu0 %v979_v0  ;;  %v403_v61 = vld [vmem:[%s1605_s9 + $0x3e0] sm:$0xff]  ;;  %v999_v62 = vpack.c.bf16 %v406_v55, %v404_v54  ;;  %v405_v63 = vld [vmem:[%s1605_s9 + $0x3f0] sm:$0xff]  ;;  %v408_v0 = vld [vmem:[%s1605_s9 + $0x408] sm:$0xff]  ;;  %v937_v2 = vpack.c.bf16 %v341_v60, %v339_v59 }
  0xa5   : > { %v410_v1 = vld [vmem:[%s1605_s9 + $0x418] sm:$0xff]  ;;  %v1001_v3 = vpack.c.bf16 %v405_v63, %v403_v61  ;;  %v407_v5 = vld [vmem:[%s1605_s9 + $0x400] sm:$0xff]  ;;  %v412_v7 = vld [vmem:[%s1605_s9 + $0x428] sm:$0xff] }
  0xa6   : > { %918 = vmatpush1.bf16.msra.mxu1 %v917_v6  ;;  %v1003_v4 = vpack.c.bf16 %v410_v1, %v408_v0  ;;  %v409_v6 = vld [vmem:[%s1605_s9 + $0x410] sm:$0xff]  ;;  %v416_v15 = vld [vmem:[%s1605_s9 + $0x448] sm:$0xff]  ;;  %v418_v16 = vld [vmem:[%s1605_s9 + $0x458] sm:$0xff] }
  0xa7   : > { %982 = vmatpush1.bf16.msra.mxu0 %v981_v8  ;;  %920 = vmatprep.subr.bf16.mxu1 %v919_v9  ;;  %v414_v8 = vld [vmem:[%s1605_s9 + $0x438] sm:$0xff]  ;;  %v267_v9 = vld [vmem:[#allocation2] sm:$0xff]  ;;  %v1005_v10 = vpack.c.bf16 %v409_v6, %v407_v5  ;;  %v269_v11 = vld [vmem:[#allocation2 + $0x10] sm:$0xff] }
  0xa8   : > { %984 = vmatprep.subr.bf16.mxu0 %v983_v13  ;;  %v1007_v12 = vpack.c.bf16 %v414_v8, %v412_v7  ;;  %v411_v13 = vld [vmem:[%s1605_s9 + $0x420] sm:$0xff]  ;;  %v413_v14 = vld [vmem:[%s1605_s9 + $0x430] sm:$0xff]  ;;  %v274_v17 = vld [vmem:[#allocation2 + $0x38] sm:$0xff] }
  0xa9   : > { %v1009_v18 = vpack.c.bf16 %v413_v14, %v411_v13  ;;  %v273_v19 = vld [vmem:[#allocation2 + $0x30] sm:$0xff]  ;;  %v275_v24 = vld [vmem:[#allocation2 + $0x40] sm:$0xff]  ;;  %v420_v25 = vld [vmem:[%s1605_s9 + $0x468] sm:$0xff] }
  0xaa   : > { %922 = vmatpush1.bf16.msra.mxu1 %v921_v20  ;;  %v276_v20 = vld [vmem:[#allocation2 + $0x48] sm:$0xff]  ;;  %v417_v23 = vld [vmem:[%s1605_s9 + $0x450] sm:$0xff]  ;;  %v278_v29 = vld [vmem:[#allocation2 + $0x58] sm:$0xff] }
  0xab   : > { %986 = vmatpush1.bf16.msra.mxu0 %v985_v21  ;;  %924 = vmatprep.subr.bf16.mxu1 %v923_v22  ;;  %v1011_v21 = vpack.c.bf16 %v418_v16, %v416_v15  ;;  %v415_v22 = vld [vmem:[%s1605_s9 + $0x440] sm:$0xff]  ;;  %v272_v27 = vld [vmem:[#allocation2 + $0x28] sm:$0xff]  ;;  %v430_v40 = vld [vmem:[%s1605_s9 + $0x4b8] sm:$0xff] }
  0xac   : > { %988 = vmatprep.subr.bf16.mxu0 %v987_v26  ;;  %v422_v26 = vld [vmem:[%s1605_s9 + $0x478] sm:$0xff]  ;;  %v1013_v28 = vpack.c.bf16 %v417_v23, %v415_v22  ;;  %v419_v31 = vld [vmem:[%s1605_s9 + $0x460] sm:$0xff]  ;;  %v428_v39 = vld [vmem:[%s1605_s9 + $0x4a8] sm:$0xff] }
  0xad   : > { %v1015_v30 = vpack.c.bf16 %v422_v26, %v420_v25  ;;  %v423_v37 = vld [vmem:[%s1605_s9 + $0x480] sm:$0xff]  ;;  %v1023_v42 = vpack.c.bf16 %v430_v40, %v428_v39  ;;  %v436_v51 = vld [vmem:[%s1605_s9 + $0x4e8] sm:$0xff]  ;;  %v438_v52 = vld [vmem:[%s1605_s9 + $0x4f8] sm:$0xff] }
  0xae   : > { %926 = vmatpush1.bf16.msra.mxu1 %v925_v32  ;;  %v421_v32 = vld [vmem:[%s1605_s9 + $0x470] sm:$0xff]  ;;  %v427_v43 = vld [vmem:[%s1605_s9 + $0x4a0] sm:$0xff]  ;;  %v1031_v54 = vpack.c.bf16 %v438_v52, %v436_v51  ;;  %v444_v63 = vld [vmem:[%s1605_s9 + $0x528] sm:$0xff] }
  0xaf   : > { %990 = vmatpush1.bf16.msra.mxu0 %v989_v33  ;;  %928 = vmatprep.subr.bf16.mxu1 %v927_v34  ;;  %v424_v33 = vld [vmem:[%s1605_s9 + $0x488] sm:$0xff]  ;;  %v426_v34 = vld [vmem:[%s1605_s9 + $0x498] sm:$0xff]  ;;  %v1017_v35 = vpack.c.bf16 %v421_v32, %v419_v31  ;;  %v431_v49 = vld [vmem:[%s1605_s9 + $0x4c0] sm:$0xff] }
  0xb0   : > { %992 = vmatprep.subr.bf16.mxu0 %v991_v38  ;;  %v1019_v36 = vpack.c.bf16 %v426_v34, %v424_v33  ;;  %v425_v38 = vld [vmem:[%s1605_s9 + $0x490] sm:$0xff]  ;;  %v435_v55 = vld [vmem:[%s1605_s9 + $0x4e0] sm:$0xff]  ;;  %v446_v0 = vld [vmem:[%s1605_s9 + $0x538] sm:$0xff] }
  0xb1   : > { %v1021_v41 = vpack.c.bf16 %v425_v38, %v423_v37  ;;  %v439_v61 = vld [vmem:[%s1605_s9 + $0x500] sm:$0xff]  ;;  %v448_v5 = vld [vmem:[%s1605_s9 + $0x548] sm:$0xff]  ;;  %v450_v6 = vld [vmem:[%s1605_s9 + $0x558] sm:$0xff] }
  0xb2   : > { %930 = vmatpush1.bf16.msra.mxu1 %v929_v44  ;;  %v429_v44 = vld [vmem:[%s1605_s9 + $0x4b0] sm:$0xff]  ;;  %v1043_v8 = vpack.c.bf16 %v450_v6, %v448_v5  ;;  %v451_v15 = vld [vmem:[%s1605_s9 + $0x560] sm:$0xff]  ;;  %v460_v23 = vld [vmem:[%s1605_s9 + $0x5a8] sm:$0xff] }
  0xb3   : > { %994 = vmatpush1.bf16.msra.mxu0 %v993_v45  ;;  %932 = vmatprep.subr.bf16.mxu1 %v931_v46  ;;  %v432_v45 = vld [vmem:[%s1605_s9 + $0x4c8] sm:$0xff]  ;;  %v434_v46 = vld [vmem:[%s1605_s9 + $0x4d8] sm:$0xff]  ;;  %v1025_v47 = vpack.c.bf16 %v429_v44, %v427_v43  ;;  %v453_v16 = vld [vmem:[%s1605_s9 + $0x570] sm:$0xff]  ;;  %v473_v44 = vlaneseq }
  0xb4   : > { %996 = vmatprep.subr.bf16.mxu0 %v995_v50  ;;  %v1027_v48 = vpack.c.bf16 %v434_v46, %v432_v45  ;;  %v433_v50 = vld [vmem:[%s1605_s9 + $0x4d0] sm:$0xff]  ;;  %v463_v33 = vld [vmem:[%s1605_s9 + $0x5c0] sm:$0xff] }
  0xb5   : > { %v1029_v53 = vpack.c.bf16 %v433_v50, %v431_v49  ;;  %v457_v22 = vld [vmem:[%s1605_s9 + $0x590] sm:$0xff]  ;;  %v467_v39 = vld [vmem:[%s1605_s9 + $0x5e0] sm:$0xff]  ;;  %v474_v45 = vshrl.u32 %v473_v44, 7 }
  0xb6   : > { %934 = vmatpush1.bf16.msra.mxu1 %v933_v56  ;;  %v437_v56 = vld [vmem:[%s1605_s9 + $0x4f0] sm:$0xff]  ;;  %v271_v43 = vld [vmem:[#allocation2 + $0x20] sm:$0xff] }
  0xb7   : > { %998 = vmatpush1.bf16.msra.mxu0 %v997_v57  ;;  %936 = vmatprep.subr.bf16.mxu1 %v935_v58  ;;  %v440_v57 = vld [vmem:[%s1605_s9 + $0x508] sm:$0xff]  ;;  %v442_v58 = vld [vmem:[%s1605_s9 + $0x518] sm:$0xff]  ;;  %v1033_v59 = vpack.c.bf16 %v437_v56, %v435_v55  ;;  %v465_v34 = vld [vmem:[%s1605_s9 + $0x5d0] sm:$0xff]  ;;  %v475_v46 = vsub.s32 0, %v474_v45  ;;  %v479_v49 = vsub.s32 1, %v474_v45 }
  0xb8   : > { %1000 = vmatprep.subr.bf16.mxu0 %v999_v62  ;;  %v1035_v60 = vpack.c.bf16 %v442_v58, %v440_v57  ;;  %v441_v62 = vld [vmem:[%s1605_s9 + $0x510] sm:$0xff]  ;;  %v1061_v37 = vpack.c.bf16 %v465_v34, %v463_v33 }
  0xb9   : > { %v1037_v1 = vpack.c.bf16 %v441_v62, %v439_v61  ;;  %v469_v40 = vld [vmem:[%s1605_s9 + $0x5f0] sm:$0xff] }
  0xba   : > { %938 = vmatpush1.bf16.msra.mxu1 %v937_v2  ;;  %v1039_v2 = vpack.c.bf16 %v446_v0, %v444_v63 }
  0xbb   : > { %1002 = vmatpush1.bf16.msra.mxu0 %v1001_v3  ;;  %1067 = vmatprep.subr.bf16.mxu1 %v1003_v4  ;;  %v443_v3 = vld [vmem:[%s1605_s9 + $0x520] sm:$0xff] }
  0xbc   : > { %1004 = vmatprep.subr.bf16.mxu0 %v1003_v4  ;;  %v445_v4 = vld [vmem:[%s1605_s9 + $0x530] sm:$0xff] }
  0xbd   : > { %548 = vmatmul.mubr.f32.vlgmr.msra.gmra.mrb[0].mxu1 %v267_v9  ;;  %v1041_v7 = vpack.c.bf16 %v445_v4, %v443_v3  ;;  %v447_v9 = vld [vmem:[%s1605_s9 + $0x540] sm:$0xff] }
  0xbe   : > { %625 = vmatmul.mubr.f32.vlgmr.msra.gmra.mrb[0].mxu0 %v269_v11  ;;  %1083 = vmatpush1.bf16.msra.mxu1 %v1005_v10  ;;  %v452_v11 = vld [vmem:[%s1605_s9 + $0x568] sm:$0xff] }
  0xbf   : > { %1006 = vmatpush1.bf16.msra.mxu0 %v1005_v10  ;;  %1068 = vmatprep.subr.bf16.mxu1 %v1007_v12  ;;  %v449_v10 = vld [vmem:[%s1605_s9 + $0x550] sm:$0xff] }
  0xc0   : > { %1008 = vmatprep.subr.bf16.mxu0 %v1007_v12  ;;  %553 = vmatprep.mubr.f32.mxu1 %v274_v17  ;;  %v454_v12 = vld [vmem:[%s1605_s9 + $0x578] sm:$0xff]  ;;  %v1045_v13 = vpack.c.bf16 %v449_v10, %v447_v9  ;;  %v456_v17 = vld [vmem:[%s1605_s9 + $0x588] sm:$0xff] }
  0xc1   : > { %554 = vmatmul.mubr.f32.gmra.mrb[2].mxu1 %v273_v19  ;;  %630 = vmatprep.mubr.f32.mxu0 %v276_v20  ;;  %v1047_v14 = vpack.c.bf16 %v454_v12, %v452_v11  ;;  %v1049_v19 = vpack.c.bf16 %v453_v16, %v451_v15 }
  0xc2   : > { %1084 = vmatpush1.bf16.msra.mxu1 %v1009_v18  ;;  %631 = vmatmul.mubr.f32.gmra.mrb[2].mxu0 %v275_v24  ;;  %v462_v24 = vld [vmem:[%s1605_s9 + $0x5b8] sm:$0xff] }
  0xc3   : > { %1010 = vmatpush1.bf16.msra.mxu0 %v1009_v18  ;;  %1069 = vmatprep.subr.bf16.mxu1 %v1011_v21  ;;  %v458_v18 = vld [vmem:[%s1605_s9 + $0x598] sm:$0xff]  ;;  %v1055_v26 = vpack.c.bf16 %v462_v24, %v460_v23 }
  0xc4   : > { %1012 = vmatprep.subr.bf16.mxu0 %v1011_v21  ;;  %701 = vmatprep.mubr.f32.mxu0 %v272_v27  ;;  %v1051_v20 = vpack.c.bf16 %v458_v18, %v456_v17  ;;  %v455_v21 = vld [vmem:[%s1605_s9 + $0x580] sm:$0xff] }
  0xc5   : > { %707 = vmatprep.mubr.f32.mxu1 %v278_v29  ;;  %v1053_v25 = vpack.c.bf16 %v457_v22, %v455_v21  ;;  %v459_v27 = vld [vmem:[%s1605_s9 + $0x5a0] sm:$0xff]  ;;  %v464_v29 = vld [vmem:[%s1605_s9 + $0x5c8] sm:$0xff] }
  0xc6   : > { %1085 = vmatpush1.bf16.msra.mxu1 %v1013_v28 }
  0xc7   : > { %1014 = vmatpush1.bf16.msra.mxu0 %v1013_v28  ;;  %1070 = vmatprep.subr.bf16.mxu1 %v1015_v30  ;;  %v461_v28 = vld [vmem:[%s1605_s9 + $0x5b0] sm:$0xff] }
  0xc8   : > { %1016 = vmatprep.subr.bf16.mxu0 %v1015_v30  ;;  %v466_v30 = vld [vmem:[%s1605_s9 + $0x5d8] sm:$0xff]  ;;  %v1057_v31 = vpack.c.bf16 %v461_v28, %v459_v27 }
  0xc9   : > { %v1059_v32 = vpack.c.bf16 %v466_v30, %v464_v29 }
  0xca   : > { %1086 = vmatpush1.bf16.msra.mxu1 %v1017_v35 }
  0xcb   : > { %1018 = vmatpush1.bf16.msra.mxu0 %v1017_v35  ;;  %1071 = vmatprep.subr.bf16.mxu1 %v1019_v36  ;;  %v468_v35 = vld [vmem:[%s1605_s9 + $0x5e8] sm:$0xff] }
  0xcc   : > { %1020 = vmatprep.subr.bf16.mxu0 %v1019_v36  ;;  %v470_v36 = vld [vmem:[%s1605_s9 + $0x5f8] sm:$0xff] }
  0xcd   : > { %v1063_v38 = vpack.c.bf16 %v470_v36, %v468_v35 }
  0xce   : > { %1087 = vmatpush1.bf16.msra.mxu1 %v1021_v41 }
  0xcf   : > { %1022 = vmatpush1.bf16.msra.mxu0 %v1021_v41  ;;  %1072 = vmatprep.subr.bf16.mxu1 %v1023_v42  ;;  %v1065_v41 = vpack.c.bf16 %v469_v40, %v467_v39 }
  0xd0   : > { %1024 = vmatprep.subr.bf16.mxu0 %v1023_v42  ;;  %v277_v42 = vld [vmem:[#allocation2 + $0x50] sm:$0xff] }
  0xd2   : > { %1088 = vmatpush1.bf16.msra.mxu1 %v1025_v47 }
  0xd3   : > { %1026 = vmatpush1.bf16.msra.mxu0 %v1025_v47  ;;  %1073 = vmatprep.subr.bf16.mxu1 %v1027_v48  ;;  %v471_v47 = vld [vmem:[%s234_s30] sm:$0x3] }
  0xd4   : > { %1028 = vmatprep.subr.bf16.mxu0 %v1027_v48  ;;  %v476_v51 = vrot.slane %v471_v47, %v475_v46  ;;  %v480_v52 = vrot.slane %v471_v47, %v479_v49 }
  0xd6   : > { %1089 = vmatpush1.bf16.msra.mxu1 %v1029_v53 }
  0xd7   : > { %1030 = vmatpush1.bf16.msra.mxu0 %v1029_v53  ;;  %1074 = vmatprep.subr.bf16.mxu1 %v1031_v54 }
  0xd8   : > { %1032 = vmatprep.subr.bf16.mxu0 %v1031_v54 }
  0xda   : > { %1090 = vmatpush1.bf16.msra.mxu1 %v1033_v59 }
  0xdb   : > { %1034 = vmatpush1.bf16.msra.mxu0 %v1033_v59  ;;  %1075 = vmatprep.subr.bf16.mxu1 %v1035_v60 }
  0xdc   : > { %1036 = vmatprep.subr.bf16.mxu0 %v1035_v60 }
  0xde   : > { %1091 = vmatpush1.bf16.msra.mxu1 %v1037_v1 }
  0xdf   : > { %1038 = vmatpush1.bf16.msra.mxu0 %v1037_v1  ;;  %1076 = vmatprep.subr.bf16.mxu1 %v1039_v2 }
  0xe0   : > { %1040 = vmatprep.subr.bf16.mxu0 %v1039_v2 }
  0xe2   : > { %1092 = vmatpush1.bf16.msra.mxu1 %v1041_v7 }
  0xe3   : > { %1042 = vmatpush1.bf16.msra.mxu0 %v1041_v7  ;;  %1077 = vmatprep.subr.bf16.mxu1 %v1043_v8 }
  0xe4   : > { %1044 = vmatprep.subr.bf16.mxu0 %v1043_v8 }
  0xe6   : > { %1093 = vmatpush1.bf16.msra.mxu1 %v1045_v13 }
  0xe7   : > { %1046 = vmatpush1.bf16.msra.mxu0 %v1045_v13  ;;  %1078 = vmatprep.subr.bf16.mxu1 %v1047_v14 }
  0xe8   : > { %1048 = vmatprep.subr.bf16.mxu0 %v1047_v14 }
  0xea   : > { %1094 = vmatpush1.bf16.msra.mxu1 %v1049_v19 }
  0xeb   : > { %1050 = vmatpush1.bf16.msra.mxu0 %v1049_v19  ;;  %1079 = vmatprep.subr.bf16.mxu1 %v1051_v20 }
  0xec   : > { %1052 = vmatprep.subr.bf16.mxu0 %v1051_v20 }
  0xee   : > { %1095 = vmatpush1.bf16.msra.mxu1 %v1053_v25 }
  0xef   : > { %1054 = vmatpush1.bf16.msra.mxu0 %v1053_v25  ;;  %1080 = vmatprep.subr.bf16.mxu1 %v1055_v26 }
  0xf0   : > { %1056 = vmatprep.subr.bf16.mxu0 %v1055_v26 }
  0xf2   : > { %1096 = vmatpush1.bf16.msra.mxu1 %v1057_v31 }
  0xf3   : > { %1058 = vmatpush1.bf16.msra.mxu0 %v1057_v31  ;;  %1081 = vmatprep.subr.bf16.mxu1 %v1059_v32 }
  0xf4   : > { %1060 = vmatprep.subr.bf16.mxu0 %v1059_v32 }
  0xf6   : > { %1097 = vmatpush1.bf16.msra.mxu1 %v1061_v37 }
  0xf7   : > { %1062 = vmatpush1.bf16.msra.mxu0 %v1061_v37  ;;  %1082 = vmatprep.subr.bf16.mxu1 %v1063_v38 }
  0xf8   : > { %1064 = vmatprep.subr.bf16.mxu0 %v1063_v38 }
  0xfa   : > { %1098 = vmatpush1.bf16.msra.mxu1 %v1065_v41 }
  0xfb   : > { %1066 = vmatpush1.bf16.msra.mxu0 %v1065_v41 }
  0xfd   : > { %708 = vmatmul.mubr.f32.vlgmr.msra.gmra.mrb[4].mxu1 %v277_v42 }
  0xfe   : > { %702 = vmatmul.mubr.f32.vlgmr.msra.gmra.mrb[0].mxu0 %v271_v43 }
 0x190   : > { %v549_v48 = vpop.f32.mrb[0].mxu1 }
 0x191   : > { %v551_v50 = vpop.f32.mrb[1].mxu1  ;;  %v550_v61 = vadd.f32 %v549_v48, %v476_v51 }
 0x192   : > { %v552_v63 = vadd.f32 %v551_v50, %v480_v52 }
 0x194   : > { %v555_v53 = vpop.f32.mrb[2].mxu1 }
 0x195   : > { %v556_v54 = vadd.f32 %v555_v53, %v476_v51  ;;  %v557_v55 = vpop.f32.mrb[3].mxu1  ;;  %v632_v56 = vpop.f32.mrb[2].mxu0 }
 0x196   : > { %v558_v57 = vadd.f32 %v557_v55, %v480_v52  ;;  %v634_v58 = vpop.f32.mrb[3].mxu0 }
 0x197   : > { %v633_v59 = vadd.f32 %v632_v56, %v556_v54 }
 0x198   : > { %v635_v60 = vadd.f32 %v634_v58, %v558_v57 }
 0x1d0   : > { %v709_v62 = vpop.f32.mrb[4].mxu1 }
 0x1d1   : > { %v703_v0 = vpop.f32.mrb[0].mxu0  ;;  %v710_v1 = vadd.f32 %v709_v62, %v633_v59  ;;  %v711_v2 = vpop.f32.mrb[5].mxu1 }
 0x1d2   : > { %v1100_v3 = vadd.f32 %v703_v0, %v550_v61  ;;  %v705_v4 = vpop.f32.mrb[1].mxu0  ;;  %v712_v5 = vadd.f32 %v711_v2, %v635_v60 }
 0x1d3   : > { %716 = vst [vmem:[%s261_s8 + $0x10] sm:$0xff] %v710_v1  ;;  %v1102_v6 = vadd.f32 %v705_v4, %v552_v63 }
 0x1d4   : > { %714 = vst [vmem:[%s261_s8] sm:$0xff] %v1100_v3  ;;  %717 = vst [vmem:[%s261_s8 + $0x18] sm:$0xff] %v712_v5 }
 0x1d5   : > { %715 = vst [vmem:[%s261_s8 + $0x8] sm:$0xff] %v1102_v6 }
 0x1d6   : > { %1300 = shalt.err (!%p1297_p8)
}
 0x1d7   : > { %s1301_s18 = scalar_lea.hbm %s1811_s15, 512  ;;  %s1305_s6 = scalar_lea.hbm %s1863_s3, 1024 }
 0x1d8   : > { %p1302_p10 = scmp.ne.s32.totalorder %s1811_s15, %s1301_s18  ;;  %p1306_p3 = scmp.lt.u32.totalorder %s1811_s15, %s1863_s3 }
 0x1d9   : > { %p1307_p2 = scmp.lt.u32.totalorder %s1305_s6, %s1301_s18  ;;  %p1309_p4 = scmp.lt.u32.totalorder %s1301_s18, %s1811_s15 }
 0x1da   : > { %p1303_p13 = pnand %p1302_p10, %p1888_p6 }
 0x1db   : > { %p1308_p11 = por %p1307_p2, %p1306_p3 }
 0x1dc   : > { %p1304_p7 = pneg %p1303_p13 }
 0x1dd   : > { %p1310_p1 = por %p1309_p4, %p1308_p11 }
 0x1df   : > { %p1311_p12 = pnand %p1310_p1, %p1304_p7 }
 0x1e1   : > { %1314 = shalt.err (!%p1311_p12)
}
 0x1e2   : > { %s1384_s30 = smov 256   ;;  %s1385_s7 = smov 512  }
 0x1e3   : > { %s1386_s8 = smov 16  }
 0x1e4   : > { %1121 = dma.vmem_to_hbm [thread:$0]  (%p1888_p6), %s1806_s25, 512, %s1811_s15, %s719_s23, %s1384_s30, %s1385_s7, %s1386_s8  }
 0x1e5 PF: > { %s750_s27 = sand.u32 1, %s1353_s12   ;;  %p1889_p0 = scmp.ne.s32.totalorder %s1878_s4, 0 }
 0x1e6   : > { %p1890_p9 = scmp.ge.s32.totalorder %s1373_s17, 2  ;;  %s751_s22 = scalar_lea.sflag [#allocation4], %s750_s27 }
 0x1e8   : > { %p1135_p5 = pnand %p1890_p9, %p1889_p0 }
 0x1ea   : > { %1348 = dma.done.wait (!%p1135_p5), %s751_s22, 512  }
 0x1eb   : > { %1350 = vsyncadd (!%p1135_p5), %s751_s22, 4294966784  ;;  %s20_s17 = sadd.s32 1, %s1373_s17   ;;  %s1891_s28 = sld [smem:[#allocation12_spill]] }
 0x1ec   : > { %p17_p8 = scmp.ge.s32.totalorder %s20_s17, 4   ;;  %s1892_s12 = smov %s1357_s13 }
 0x1ed   : > { %s1893_s13 = smov %s1361_s14  ;;  %s1894_s14 = smov %s1455_s24 }
 0x1ee   : > { %s1895_s15 = smov %s1369_s16  ;;  %19 = sbr.rel (!%p17_p8) target bundleno = 9 (0x9), region = 94 }
 0x1f1   : > { %s1896_s16 = smov %s1891_s28 }
 0x1f5   :  { %756 = vsyncpa [#allocation3], 1 }
 0x1f6   :  { %758 = vsyncpa [#allocation3 + $0x1], 1 }
 0x1f7   :  { %759 = vsyncpa [#allocation6], 1 }
 0x1f8   :  { %761 = vsyncpa [#allocation6 + $0x1], 1 }
 0x1f9   :  { %762 = vsyncpa [#allocation4], 1 }
 0x1fa   :  { %764 = vsyncpa [#allocation4 + $0x1], 1 }

</bundles_post_ra>
